<compile_context>
chip_gen: v7x
topology: tpu7x:2x2x1
jax: 0.10.0
libtpu: 0.0.40
codegen_flags: <defaults>
</compile_context>

<pallas_src>
import functools

import jax
import jax.numpy as jnp
from jax.experimental import pallas as pl
from jax.experimental.pallas import tpu as pltpu

_LANE = 128


def _cdiv(a, b):
    return -(-a // b)


def _round_up(n, m):
    return ((n + m - 1) // m) * m


def _pad_to(a, shape):
    pads = [(0, t - s) for s, t in zip(a.shape, shape)]
    if all(p == (0, 0) for p in pads):
        return a
    return jnp.pad(a, pads)


def _dec_kernel(x_ref, w1_ref, b1_ref, w2_ref, b2_ref, mu_t_ref, mu_sq_ref,
                z_ref, q_ref, *, alpha):
    # ---- encoder: Linear + ReLU (MXU matmul + VPU max) ----
    x = x_ref[...]                                                   # (TB, Dinp)
    h = jnp.dot(x, w1_ref[...],
                preferred_element_type=jnp.float32) + b1_ref[...]    # (TB, Hp) f32
    h = jnp.maximum(h, 0.0)

    # ---- _enc_mu: Linear ----
    z = jnp.dot(h.astype(w2_ref.dtype), w2_ref[...],
                preferred_element_type=jnp.float32) + b2_ref[...]    # (TB, Zp) f32
    z_ref[...] = z.astype(z_ref.dtype)

    # ---- soft assignment (Student's t kernel) ----
    # ||z - mu||^2 = ||z||^2 + ||mu||^2 - 2 * z @ mu^T  (contraction on MXU).
    # Padded cluster columns: mu^T column is exactly 0 -> cross == 0, and
    # ||mu||^2 is +inf -> dist = +inf -> q = 0 exactly (mask hoisted to wrapper).
    cross = jnp.dot(z.astype(mu_t_ref.dtype), mu_t_ref[...],
                    preferred_element_type=jnp.float32)              # (TB, Kp)
    z_sq = jnp.sum(z * z, axis=1, keepdims=True)                     # (TB, 1)
    dist = jnp.maximum(z_sq + mu_sq_ref[...] - 2.0 * cross, 0.0)     # (TB, Kp)

    # q = 1 / (1 + dist / alpha): exact reciprocal (tolerance-critical).
    q = pl.reciprocal(1.0 + dist * (1.0 / alpha))

    # q ** (alpha + 1); the original trailing '/ 2.0' is a constant row factor
    # that cancels exactly in the normalization below, so it is dropped.
    exp = float(alpha) + 1.0
    if exp == 1.0:
        pass
    elif exp.is_integer() and 1.0 < exp <= 16.0:
        # exponentiation by squaring on the VPU (avoids transcendental pow)
        n = int(exp)
        base = q
        result = None
        while n:
            if n & 1:
                result = base if result is None else result * base
            n >>= 1
            if n:
                base = base * base
        q = result
    else:
        # non-integer exponent: guard q==0 (padded clusters) against log(0)
        q = jnp.where(q > 0.0, jnp.power(q, exp), 0.0)

    q = q * pl.reciprocal(jnp.sum(q, axis=1, keepdims=True))
    q_ref[...] = q.astype(q_ref.dtype)


def _choose_tb(B, block_b, rows_cap):
    """Pick the batch tile: multiple of 8, <= block_b and the VMEM row cap,
    low batch-padding waste, and >=2 grid steps when the batch is big enough
    (so the 'parallel' axis can shard across v7x's two TensorCores)."""
    b8 = _round_up(max(B, 1), 8)
    cap = max(8, (min(block_b, rows_cap, b8) // 8) * 8)
    if b8 <= cap:
        if b8 >= 256:
            return _round_up(_cdiv(b8, 2), 8)   # 2 tiles -> megacore sharding
        return b8
    g = _cdiv(b8, cap)
    best_tb, best_waste = cap, (g * cap) / b8
    for gg in range(g, g + 32):
        tb = _round_up(_cdiv(b8, gg), 8)
        waste = (gg * tb) / b8
        if waste < best_waste - 1e-9:
            best_tb, best_waste = tb, waste
        if best_waste <= 1.0625:
            break
    return best_tb


def dec_forward(x, w1, b1, w2, b2, mu, *, alpha=1.0, block_b=1024,
                mxu_bf16=False):
    B, Din = x.shape
    H = w1.shape[1]
    Z = w2.shape[1]
    K = mu.shape[0]

    # Lane-dense zero padding of contraction and output dims (exact).
    Dinp = _round_up(Din, _LANE)
    Hp = _round_up(H, _LANE)
    Zp = _round_up(Z, _LANE)
    Kp = _round_up(K, _LANE)

    mxu_dtype = jnp.bfloat16 if mxu_bf16 else jnp.float32

    w1_p = _pad_to(w1, (Dinp, Hp)).astype(mxu_dtype)
    b1_p = _pad_to(b1.reshape(1, -1), (1, Hp)).astype(jnp.float32)
    w2_p = _pad_to(w2, (Hp, Zp)).astype(mxu_dtype)
    b2_p = _pad_to(b2.reshape(1, -1), (1, Zp)).astype(jnp.float32)

    mu_p = _pad_to(mu.astype(jnp.float32), (Kp, Zp))
    mu_sq = jnp.sum(mu_p * mu_p, axis=1)                  # (Kp,) hoisted precompute
    if K < Kp:
        # Padded-cluster mask hoisted out of the kernel: +inf distance -> q == 0.
        mu_sq = jnp.where(jnp.arange(Kp) < K, mu_sq, jnp.float32(jnp.inf))
    mu_sq = mu_sq[None, :]                                # (1, Kp)
    mu_t = mu_p.T.astype(mxu_dtype)                       # (Zp, Kp) for z @ mu^T

    # ---- VMEM plan: resident weights + streamed/per-row bytes ----------------
    wbytes = 2 if mxu_bf16 else 4
    weight_bytes = ((Dinp * Hp + Hp * Zp + Zp * Kp) * wbytes
                    + (Hp + Zp + Kp) * 4)
    # double-buffered x tile + double-buffered z/q output tiles + f32 temporaries
    row_bytes = 2 * Dinp * wbytes + 2 * (Zp + Kp) * 4 + (Hp + 2 * Zp + 4 * Kp) * 4
    budget = 40 << 20   # conservative across v5e/v6e (128 MiB) and v7x (64 MiB)
    rows_cap = max(8, (budget - 2 * weight_bytes) // row_bytes)
    # TODO(synk): if the resident weights alone blow the VMEM budget (huge Din*H
    # on v7x), add an 'arbitrary' contraction grid axis over Din with a
    # (tb, Hp) f32 accumulator instead of shrinking the batch tile.

    tb = _choose_tb(B, block_b, rows_cap)
    Bp = _round_up(B, tb)
    x_p = _pad_to(x, (Bp, Din))
    x_p = _pad_to(x_p, (Bp, Dinp)).astype(mxu_dtype)
    grid = (Bp // tb,)

    est = 2 * weight_bytes + tb * row_bytes
    vmem_limit = int(min(max(int(est * 1.5) + (4 << 20), 32 << 20), 100 << 20))

    kernel = functools.partial(_dec_kernel, alpha=float(alpha))

    out_specs = (
        pl.BlockSpec((tb, Zp), lambda i: (i, 0)),    # z tile (lane-dense)
        pl.BlockSpec((tb, Kp), lambda i: (i, 0)),    # q tile (lane-dense)
    )
    out_shape = (
        jax.ShapeDtypeStruct((Bp, Zp), jnp.float32),
        jax.ShapeDtypeStruct((Bp, Kp), jnp.float32),
    )

    def run(single_buffer_weights):
        def resident(shape):
            # Constant index_map => loaded once; single-buffer to halve VMEM
            # footprint (v7x headroom) when supported.
            if single_buffer_weights:
                return pl.BlockSpec(shape, lambda i: (0, 0),
                                    pipeline_mode=pl.Buffered(1))
            return pl.BlockSpec(shape, lambda i: (0, 0))

        in_specs = [
            pl.BlockSpec((tb, Dinp), lambda i: (i, 0)),   # x tile (streamed)
            resident((Dinp, Hp)),                         # w1
            resident((1, Hp)),                            # b1
            resident((Hp, Zp)),                           # w2
            resident((1, Zp)),                            # b2
            resident((Zp, Kp)),                           # mu^T
            resident((1, Kp)),                            # ||mu||^2 (+inf padded)
        ]
        return pl.pallas_call(
            kernel,
            grid=grid,
            in_specs=in_specs,
            out_specs=out_specs,
            out_shape=out_shape,
            compiler_params=pltpu.CompilerParams(
                dimension_semantics=("parallel",),
                vmem_limit_bytes=vmem_limit),
        )(x_p, w1_p, b1_p, w2_p, b2_p, mu_t, mu_sq)

    single_buffer = hasattr(pl, "Buffered")
    try:
        z_p, q_p = run(single_buffer_weights=single_buffer)
    except Exception:
        if not single_buffer:
            raise
        # Fall back to default double-buffered weights if pipeline_mode on the
        # top-level pallas_call is rejected by this Pallas/Mosaic version.
        z_p, q_p = run(single_buffer_weights=False)

    return z_p[:B, :Z], q_p[:B, :K]


def _ref_forward(x, w1, b1, w2, b2, mu, alpha=1.0):
    # Pure-JAX reference, faithful to the PyTorch forward (incl. precedence of
    # `q ** (alpha + 1.0) / 2.0`).
    h = jnp.maximum(x @ w1 + b1, 0.0)
    z = h @ w2 + b2
    dist = jnp.sum((z[:, None, :] - mu[None, :, :]) ** 2, axis=2)
    q = 1.0 / (1.0 + dist / alpha)
    q = q ** (alpha + 1.0) / 2.0
    q = q / jnp.sum(q, axis=1, keepdims=True)
    return z, q


def _make_inputs(key, B, DIN, HID, ZDIM, K):
    ks = jax.random.split(key, 6)
    x = jax.random.normal(ks[0], (B, DIN), dtype=jnp.float32)
    w1 = jax.random.normal(ks[1], (DIN, HID), dtype=jnp.float32) * 0.1
    b1 = jax.random.normal(ks[2], (HID,), dtype=jnp.float32) * 0.1
    w2 = jax.random.normal(ks[3], (HID, ZDIM), dtype=jnp.float32) * 0.1
    b2 = jax.random.normal(ks[4], (ZDIM,), dtype=jnp.float32) * 0.1
    mu = jax.random.normal(ks[5], (K, ZDIM), dtype=jnp.float32)
    return x, w1, b1, w2, b2, mu


if __name__ == "__main__":
    key = jax.random.PRNGKey(0)
    k1, k2 = jax.random.split(key)

    # Case 1: DEC(input_dim=32, z_dim=16, n_clusters=10, encodeLayer=[64]),
    # alpha=1.0, tiny batch (single-tile grid), strict tolerance (f32 MXU path).
    x, w1, b1, w2, b2, mu = _make_inputs(k1, 8, 32, 64, 16, 10)
    z, q = dec_forward(x, w1, b1, w2, b2, mu, alpha=1.0)
    jax.block_until_ready((z, q))
    z_r, q_r = _ref_forward(x, w1, b1, w2, b2, mu, 1.0)
    assert z.shape == (8, 16) and q.shape == (8, 10)
    assert jnp.allclose(z, z_r, atol=1e-5, rtol=1e-4)
    assert jnp.allclose(q, q_r, atol=1e-5, rtol=1e-4)
    assert jnp.allclose(jnp.sum(q, axis=1), jnp.ones((8,)), atol=1e-5)

    # Case 2: ragged dims, multi-tile batch grid (low-waste tb), alpha=2.0
    # (integer-exponent path), still strict tolerance on the f32 path.
    x2, w1_2, b1_2, w2_2, b2_2, mu2 = _make_inputs(k2, 300, 200, 96, 10, 12)
    z2, q2 = dec_forward(x2, w1_2, b1_2, w2_2, b2_2, mu2, alpha=2.0, block_b=128)
    jax.block_until_ready((z2, q2))
    z2_r, q2_r = _ref_forward(x2, w1_2, b1_2, w2_2, b2_2, mu2, 2.0)
    assert z2.shape == (300, 10) and q2.shape == (300, 12)
    assert jnp.allclose(z2, z2_r, atol=1e-5, rtol=1e-4)
    assert jnp.allclose(q2, q2_r, atol=1e-5, rtol=1e-4)

    # Case 3: bf16 MXU-input path (native MXU rate on v6e/v7x) with relaxed
    # tolerance; row-normalization remains exact in f32.
    z3, q3 = dec_forward(x, w1, b1, w2, b2, mu, alpha=1.0, mxu_bf16=True)
    jax.block_until_ready((z3, q3))
    assert jnp.allclose(z3, z_r, atol=5e-2, rtol=5e-2)
    assert jnp.allclose(q3, q_r, atol=5e-2)
    assert jnp.allclose(jnp.sum(q3, axis=1), jnp.ones((8,)), atol=1e-4)

    print("KERNEL_OK")
</pallas_src>

<mosaic_0001>
module attributes {stable_mosaic.version = 11 : i64} {
  func.func @_dec_kernel(%arg0: i32, %arg1: memref<8x128xf32, #tpu.memory_space<vmem>>, %arg2: memref<128x128xf32, #tpu.memory_space<vmem>>, %arg3: memref<1x128xf32, #tpu.memory_space<vmem>>, %arg4: memref<128x128xf32, #tpu.memory_space<vmem>>, %arg5: memref<1x128xf32, #tpu.memory_space<vmem>>, %arg6: memref<128x128xf32, #tpu.memory_space<vmem>>, %arg7: memref<1x128xf32, #tpu.memory_space<vmem>>, %arg8: memref<8x128xf32, #tpu.memory_space<vmem>>, %arg9: memref<8x128xf32, #tpu.memory_space<vmem>>) attributes {dimension_semantics = [#tpu.dimension_semantics<parallel>], iteration_bounds = array<i64: 1>, scalar_prefetch = 0 : i64, scratch_operands = 0 : i64, tpu.core_type = #tpu.core_type<tc>, window_params = [{transform_indices = @transform_0, window_bounds = array<i64: 8, 128>}, {pipeline_mode = #tpu.pipeline_mode<synchronous>, transform_indices = @transform_1, window_bounds = array<i64: 128, 128>}, {pipeline_mode = #tpu.pipeline_mode<synchronous>, transform_indices = @transform_2, window_bounds = array<i64: 1, 128>}, {pipeline_mode = #tpu.pipeline_mode<synchronous>, transform_indices = @transform_3, window_bounds = array<i64: 128, 128>}, {pipeline_mode = #tpu.pipeline_mode<synchronous>, transform_indices = @transform_4, window_bounds = array<i64: 1, 128>}, {pipeline_mode = #tpu.pipeline_mode<synchronous>, transform_indices = @transform_5, window_bounds = array<i64: 128, 128>}, {pipeline_mode = #tpu.pipeline_mode<synchronous>, transform_indices = @transform_6, window_bounds = array<i64: 1, 128>}, {transform_indices = @transform_7, window_bounds = array<i64: 8, 128>}, {transform_indices = @transform_8, window_bounds = array<i64: 8, 128>}]} {
    %c0 = arith.constant 0 : index
    %c0_0 = arith.constant 0 : index
    %0 = vector.load %arg1[%c0, %c0_0] : memref<8x128xf32, #tpu.memory_space<vmem>>, vector<8x128xf32>
    %c0_1 = arith.constant 0 : index
    %c0_2 = arith.constant 0 : index
    %1 = vector.load %arg2[%c0_1, %c0_2] : memref<128x128xf32, #tpu.memory_space<vmem>>, vector<128x128xf32>
    %cst = arith.constant dense<0.000000e+00> : vector<8x128xf32>
    %2 = tpu.matmul %0, %1, %cst {dimension_numbers = #tpu.dot_dimension_numbers<[1], [0], [0], [1], [0, 0, 1, 1], [], []>} : vector<8x128xf32>, vector<128x128xf32>, vector<8x128xf32> -> vector<8x128xf32>
    %c0_3 = arith.constant 0 : index
    %c0_4 = arith.constant 0 : index
    %3 = vector.load %arg3[%c0_3, %c0_4] : memref<1x128xf32, #tpu.memory_space<vmem>>, vector<1x128xf32>
    %4 = vector.broadcast %3 : vector<1x128xf32> to vector<8x128xf32>
    %5 = arith.addf %2, %4 : vector<8x128xf32>
    %cst_5 = arith.constant 0.000000e+00 : f32
    %6 = vector.broadcast %cst_5 : f32 to vector<8x128xf32>
    %7 = arith.maximumf %5, %6 : vector<8x128xf32>
    %c0_6 = arith.constant 0 : index
    %c0_7 = arith.constant 0 : index
    %8 = vector.load %arg4[%c0_6, %c0_7] : memref<128x128xf32, #tpu.memory_space<vmem>>, vector<128x128xf32>
    %cst_8 = arith.constant dense<0.000000e+00> : vector<8x128xf32>
    %9 = tpu.matmul %7, %8, %cst_8 {dimension_numbers = #tpu.dot_dimension_numbers<[1], [0], [0], [1], [0, 0, 1, 1], [], []>} : vector<8x128xf32>, vector<128x128xf32>, vector<8x128xf32> -> vector<8x128xf32>
    %c0_9 = arith.constant 0 : index
    %c0_10 = arith.constant 0 : index
    %10 = vector.load %arg5[%c0_9, %c0_10] : memref<1x128xf32, #tpu.memory_space<vmem>>, vector<1x128xf32>
    %11 = vector.broadcast %10 : vector<1x128xf32> to vector<8x128xf32>
    %12 = arith.addf %9, %11 : vector<8x128xf32>
    %c0_11 = arith.constant 0 : index
    %c0_12 = arith.constant 0 : index
    %13 = vector.load %arg8[%c0_11, %c0_12] : memref<8x128xf32, #tpu.memory_space<vmem>>, vector<8x128xf32>
    tpu.vector_store %arg8[%c0_11, %c0_12], %12 {strides = array<i32>} : memref<8x128xf32, #tpu.memory_space<vmem>>, vector<8x128xf32>,
    %c0_13 = arith.constant 0 : index
    %c0_14 = arith.constant 0 : index
    %14 = vector.load %arg6[%c0_13, %c0_14] : memref<128x128xf32, #tpu.memory_space<vmem>>, vector<128x128xf32>
    %cst_15 = arith.constant dense<0.000000e+00> : vector<8x128xf32>
    %15 = tpu.matmul %12, %14, %cst_15 {dimension_numbers = #tpu.dot_dimension_numbers<[1], [0], [0], [1], [0, 0, 1, 1], [], []>} : vector<8x128xf32>, vector<128x128xf32>, vector<8x128xf32> -> vector<8x128xf32>
    %16 = arith.mulf %12, %12 : vector<8x128xf32>
    %cst_16 = arith.constant dense<0.000000e+00> : vector<8xf32>
    %17 = vector.multi_reduction <add>, %16, %cst_16 [1] : vector<8x128xf32> to vector<8xf32>
    %18 = vector.shape_cast %17 : vector<8xf32> to vector<8x1xf32>
    %c0_17 = arith.constant 0 : index
    %c0_18 = arith.constant 0 : index
    %19 = vector.load %arg7[%c0_17, %c0_18] : memref<1x128xf32, #tpu.memory_space<vmem>>, vector<1x128xf32>
    %20 = vector.broadcast %18 : vector<8x1xf32> to vector<8x128xf32>
    %21 = vector.broadcast %19 : vector<1x128xf32> to vector<8x128xf32>
    %22 = arith.addf %20, %21 : vector<8x128xf32>
    %cst_19 = arith.constant 2.000000e+00 : f32
    %23 = vector.broadcast %cst_19 : f32 to vector<8x128xf32>
    %24 = arith.mulf %23, %15 : vector<8x128xf32>
    %25 = arith.subf %22, %24 : vector<8x128xf32>
    %cst_20 = arith.constant 0.000000e+00 : f32
    %26 = vector.broadcast %cst_20 : f32 to vector<8x128xf32>
    %27 = arith.maximumf %25, %26 : vector<8x128xf32>
    %cst_21 = arith.constant 1.000000e+00 : f32
    %28 = vector.broadcast %cst_21 : f32 to vector<8x128xf32>
    %29 = arith.mulf %27, %28 : vector<8x128xf32>
    %cst_22 = arith.constant 1.000000e+00 : f32
    %30 = vector.broadcast %cst_22 : f32 to vector<8x128xf32>
    %31 = arith.addf %30, %29 : vector<8x128xf32>
    %32 = tpu.reciprocal %31 : vector<8x128xf32> -> vector<8x128xf32>
    %33 = arith.mulf %32, %32 : vector<8x128xf32>
    %cst_23 = arith.constant dense<0.000000e+00> : vector<8xf32>
    %34 = vector.multi_reduction <add>, %33, %cst_23 [1] : vector<8x128xf32> to vector<8xf32>
    %35 = vector.shape_cast %34 : vector<8xf32> to vector<8x1xf32>
    %36 = tpu.reciprocal %35 : vector<8x1xf32> -> vector<8x1xf32>
    %37 = vector.broadcast %36 : vector<8x1xf32> to vector<8x128xf32>
    %38 = arith.mulf %33, %37 : vector<8x128xf32>
    %c0_24 = arith.constant 0 : index
    %c0_25 = arith.constant 0 : index
    %39 = vector.load %arg9[%c0_24, %c0_25] : memref<8x128xf32, #tpu.memory_space<vmem>>, vector<8x128xf32>
    tpu.vector_store %arg9[%c0_24, %c0_25], %38 {strides = array<i32>} : memref<8x128xf32, #tpu.memory_space<vmem>>, vector<8x128xf32>,
    return
  }
  func.func @transform_0(%arg0: i32) -> (i32, i32) {
    %c0_i32 = arith.constant 0 : i32
    %c0_i32_0 = arith.constant 0 : i32
    return %arg0, %c0_i32 : i32, i32
  }
  func.func @transform_1(%arg0: i32) -> (i32, i32) {
    %c0_i32 = arith.constant 0 : i32
    %c0_i32_0 = arith.constant 0 : i32
    %c0_i32_1 = arith.constant 0 : i32
    return %c0_i32, %c0_i32_0 : i32, i32
  }
  func.func @transform_2(%arg0: i32) -> (i32, i32) {
    %c0_i32 = arith.constant 0 : i32
    %c0_i32_0 = arith.constant 0 : i32
    %c0_i32_1 = arith.constant 0 : i32
    return %c0_i32, %c0_i32_0 : i32, i32
  }
  func.func @transform_3(%arg0: i32) -> (i32, i32) {
    %c0_i32 = arith.constant 0 : i32
    %c0_i32_0 = arith.constant 0 : i32
    %c0_i32_1 = arith.constant 0 : i32
    return %c0_i32, %c0_i32_0 : i32, i32
  }
  func.func @transform_4(%arg0: i32) -> (i32, i32) {
    %c0_i32 = arith.constant 0 : i32
    %c0_i32_0 = arith.constant 0 : i32
    %c0_i32_1 = arith.constant 0 : i32
    return %c0_i32, %c0_i32_0 : i32, i32
  }
  func.func @transform_5(%arg0: i32) -> (i32, i32) {
    %c0_i32 = arith.constant 0 : i32
    %c0_i32_0 = arith.constant 0 : i32
    %c0_i32_1 = arith.constant 0 : i32
    return %c0_i32, %c0_i32_0 : i32, i32
  }
  func.func @transform_6(%arg0: i32) -> (i32, i32) {
    %c0_i32 = arith.constant 0 : i32
    %c0_i32_0 = arith.constant 0 : i32
    %c0_i32_1 = arith.constant 0 : i32
    return %c0_i32, %c0_i32_0 : i32, i32
  }
  func.func @transform_7(%arg0: i32) -> (i32, i32) {
    %c0_i32 = arith.constant 0 : i32
    %c0_i32_0 = arith.constant 0 : i32
    return %arg0, %c0_i32 : i32, i32
  }
  func.func @transform_8(%arg0: i32) -> (i32, i32) {
    %c0_i32 = arith.constant 0 : i32
    %c0_i32_0 = arith.constant 0 : i32
    return %arg0, %c0_i32 : i32, i32
  }
}

module attributes {stable_mosaic.version = 11 : i64} {
  func.func @_dec_kernel(%arg0: i32, %arg1: memref<8x128xf32, #tpu.memory_space<vmem>>, %arg2: memref<128x128xf32, #tpu.memory_space<vmem>>, %arg3: memref<1x128xf32, #tpu.memory_space<vmem>>, %arg4: memref<128x128xf32, #tpu.memory_space<vmem>>, %arg5: memref<1x128xf32, #tpu.memory_space<vmem>>, %arg6: memref<128x128xf32, #tpu.memory_space<vmem>>, %arg7: memref<1x128xf32, #tpu.memory_space<vmem>>, %arg8: memref<8x128xf32, #tpu.memory_space<vmem>>, %arg9: memref<8x128xf32, #tpu.memory_space<vmem>>) attributes {dimension_semantics = [#tpu.dimension_semantics<parallel>], iteration_bounds = array<i64: 1>, scalar_prefetch = 0 : i64, scratch_operands = 0 : i64, tpu.core_type = #tpu.core_type<tc>, window_params = [{transform_indices = @transform_0, window_bounds = array<i64: 8, 128>}, {pipeline_mode = #tpu.pipeline_mode<synchronous>, transform_indices = @transform_1, window_bounds = array<i64: 128, 128>}, {pipeline_mode = #tpu.pipeline_mode<synchronous>, transform_indices = @transform_2, window_bounds = array<i64: 1, 128>}, {pipeline_mode = #tpu.pipeline_mode<synchronous>, transform_indices = @transform_3, window_bounds = array<i64: 128, 128>}, {pipeline_mode = #tpu.pipeline_mode<synchronous>, transform_indices = @transform_4, window_bounds = array<i64: 1, 128>}, {pipeline_mode = #tpu.pipeline_mode<synchronous>, transform_indices = @transform_5, window_bounds = array<i64: 128, 128>}, {pipeline_mode = #tpu.pipeline_mode<synchronous>, transform_indices = @transform_6, window_bounds = array<i64: 1, 128>}, {transform_indices = @transform_7, window_bounds = array<i64: 8, 128>}, {transform_indices = @transform_8, window_bounds = array<i64: 8, 128>}]} {
    %c0 = arith.constant 0 : index
    %c0_0 = arith.constant 0 : index
    %0 = vector.load %arg1[%c0, %c0_0] : memref<8x128xf32, #tpu.memory_space<vmem>>, vector<8x128xf32>
    %c0_1 = arith.constant 0 : index
    %c0_2 = arith.constant 0 : index
    %1 = vector.load %arg2[%c0_1, %c0_2] : memref<128x128xf32, #tpu.memory_space<vmem>>, vector<128x128xf32>
    %cst = arith.constant dense<0.000000e+00> : vector<8x128xf32>
    %2 = tpu.matmul %0, %1, %cst {dimension_numbers = #tpu.dot_dimension_numbers<[1], [0], [0], [1], [0, 0, 1, 1], [], []>} : vector<8x128xf32>, vector<128x128xf32>, vector<8x128xf32> -> vector<8x128xf32>
    %c0_3 = arith.constant 0 : index
    %c0_4 = arith.constant 0 : index
    %3 = vector.load %arg3[%c0_3, %c0_4] : memref<1x128xf32, #tpu.memory_space<vmem>>, vector<1x128xf32>
    %4 = vector.broadcast %3 : vector<1x128xf32> to vector<8x128xf32>
    %5 = arith.addf %2, %4 : vector<8x128xf32>
    %cst_5 = arith.constant 0.000000e+00 : f32
    %6 = vector.broadcast %cst_5 : f32 to vector<8x128xf32>
    %7 = arith.maximumf %5, %6 : vector<8x128xf32>
    %c0_6 = arith.constant 0 : index
    %c0_7 = arith.constant 0 : index
    %8 = vector.load %arg4[%c0_6, %c0_7] : memref<128x128xf32, #tpu.memory_space<vmem>>, vector<128x128xf32>
    %cst_8 = arith.constant dense<0.000000e+00> : vector<8x128xf32>
    %9 = tpu.matmul %7, %8, %cst_8 {dimension_numbers = #tpu.dot_dimension_numbers<[1], [0], [0], [1], [0, 0, 1, 1], [], []>} : vector<8x128xf32>, vector<128x128xf32>, vector<8x128xf32> -> vector<8x128xf32>
    %c0_9 = arith.constant 0 : index
    %c0_10 = arith.constant 0 : index
    %10 = vector.load %arg5[%c0_9, %c0_10] : memref<1x128xf32, #tpu.memory_space<vmem>>, vector<1x128xf32>
    %11 = vector.broadcast %10 : vector<1x128xf32> to vector<8x128xf32>
    %12 = arith.addf %9, %11 : vector<8x128xf32>
    %c0_11 = arith.constant 0 : index
    %c0_12 = arith.constant 0 : index
    %13 = vector.load %arg8[%c0_11, %c0_12] : memref<8x128xf32, #tpu.memory_space<vmem>>, vector<8x128xf32>
    tpu.vector_store %arg8[%c0_11, %c0_12], %12 {strides = array<i32>} : memref<8x128xf32, #tpu.memory_space<vmem>>, vector<8x128xf32>,
    %c0_13 = arith.constant 0 : index
    %c0_14 = arith.constant 0 : index
    %14 = vector.load %arg6[%c0_13, %c0_14] : memref<128x128xf32, #tpu.memory_space<vmem>>, vector<128x128xf32>
    %cst_15 = arith.constant dense<0.000000e+00> : vector<8x128xf32>
    %15 = tpu.matmul %12, %14, %cst_15 {dimension_numbers = #tpu.dot_dimension_numbers<[1], [0], [0], [1], [0, 0, 1, 1], [], []>} : vector<8x128xf32>, vector<128x128xf32>, vector<8x128xf32> -> vector<8x128xf32>
    %16 = arith.mulf %12, %12 : vector<8x128xf32>
    %cst_16 = arith.constant dense<0.000000e+00> : vector<8xf32>
    %17 = vector.multi_reduction <add>, %16, %cst_16 [1] : vector<8x128xf32> to vector<8xf32>
    %18 = vector.shape_cast %17 : vector<8xf32> to vector<8x1xf32>
    %c0_17 = arith.constant 0 : index
    %c0_18 = arith.constant 0 : index
    %19 = vector.load %arg7[%c0_17, %c0_18] : memref<1x128xf32, #tpu.memory_space<vmem>>, vector<1x128xf32>
    %20 = vector.broadcast %18 : vector<8x1xf32> to vector<8x128xf32>
    %21 = vector.broadcast %19 : vector<1x128xf32> to vector<8x128xf32>
    %22 = arith.addf %20, %21 : vector<8x128xf32>
    %cst_19 = arith.constant 2.000000e+00 : f32
    %23 = vector.broadcast %cst_19 : f32 to vector<8x128xf32>
    %24 = arith.mulf %23, %15 : vector<8x128xf32>
    %25 = arith.subf %22, %24 : vector<8x128xf32>
    %cst_20 = arith.constant 0.000000e+00 : f32
    %26 = vector.broadcast %cst_20 : f32 to vector<8x128xf32>
    %27 = arith.maximumf %25, %26 : vector<8x128xf32>
    %cst_21 = arith.constant 1.000000e+00 : f32
    %28 = vector.broadcast %cst_21 : f32 to vector<8x128xf32>
    %29 = arith.mulf %27, %28 : vector<8x128xf32>
    %cst_22 = arith.constant 1.000000e+00 : f32
    %30 = vector.broadcast %cst_22 : f32 to vector<8x128xf32>
    %31 = arith.addf %30, %29 : vector<8x128xf32>
    %32 = tpu.reciprocal %31 : vector<8x128xf32> -> vector<8x128xf32>
    %33 = arith.mulf %32, %32 : vector<8x128xf32>
    %cst_23 = arith.constant dense<0.000000e+00> : vector<8xf32>
    %34 = vector.multi_reduction <add>, %33, %cst_23 [1] : vector<8x128xf32> to vector<8xf32>
    %35 = vector.shape_cast %34 : vector<8xf32> to vector<8x1xf32>
    %36 = tpu.reciprocal %35 : vector<8x1xf32> -> vector<8x1xf32>
    %37 = vector.broadcast %36 : vector<8x1xf32> to vector<8x128xf32>
    %38 = arith.mulf %33, %37 : vector<8x128xf32>
    %c0_24 = arith.constant 0 : index
    %c0_25 = arith.constant 0 : index
    %39 = vector.load %arg9[%c0_24, %c0_25] : memref<8x128xf32, #tpu.memory_space<vmem>>, vector<8x128xf32>
    tpu.vector_store %arg9[%c0_24, %c0_25], %38 {strides = array<i32>} : memref<8x128xf32, #tpu.memory_space<vmem>>, vector<8x128xf32>,
    return
  }
  func.func @transform_0(%arg0: i32) -> (i32, i32) {
    %c0_i32 = arith.constant 0 : i32
    %c0_i32_0 = arith.constant 0 : i32
    return %arg0, %c0_i32 : i32, i32
  }
  func.func @transform_1(%arg0: i32) -> (i32, i32) {
    %c0_i32 = arith.constant 0 : i32
    %c0_i32_0 = arith.constant 0 : i32
    %c0_i32_1 = arith.constant 0 : i32
    return %c0_i32, %c0_i32_0 : i32, i32
  }
  func.func @transform_2(%arg0: i32) -> (i32, i32) {
    %c0_i32 = arith.constant 0 : i32
    %c0_i32_0 = arith.constant 0 : i32
    %c0_i32_1 = arith.constant 0 : i32
    return %c0_i32, %c0_i32_0 : i32, i32
  }
  func.func @transform_3(%arg0: i32) -> (i32, i32) {
    %c0_i32 = arith.constant 0 : i32
    %c0_i32_0 = arith.constant 0 : i32
    %c0_i32_1 = arith.constant 0 : i32
    return %c0_i32, %c0_i32_0 : i32, i32
  }
  func.func @transform_4(%arg0: i32) -> (i32, i32) {
    %c0_i32 = arith.constant 0 : i32
    %c0_i32_0 = arith.constant 0 : i32
    %c0_i32_1 = arith.constant 0 : i32
    return %c0_i32, %c0_i32_0 : i32, i32
  }
  func.func @transform_5(%arg0: i32) -> (i32, i32) {
    %c0_i32 = arith.constant 0 : i32
    %c0_i32_0 = arith.constant 0 : i32
    %c0_i32_1 = arith.constant 0 : i32
    return %c0_i32, %c0_i32_0 : i32, i32
  }
  func.func @transform_6(%arg0: i32) -> (i32, i32) {
    %c0_i32 = arith.constant 0 : i32
    %c0_i32_0 = arith.constant 0 : i32
    %c0_i32_1 = arith.constant 0 : i32
    return %c0_i32, %c0_i32_0 : i32, i32
  }
  func.func @transform_7(%arg0: i32) -> (i32, i32) {
    %c0_i32 = arith.constant 0 : i32
    %c0_i32_0 = arith.constant 0 : i32
    return %arg0, %c0_i32 : i32, i32
  }
  func.func @transform_8(%arg0: i32) -> (i32, i32) {
    %c0_i32 = arith.constant 0 : i32
    %c0_i32_0 = arith.constant 0 : i32
    return %arg0, %c0_i32 : i32, i32
  }
}

</mosaic_0001>

<bundles_post_ra>
// kernel: tpu_custom_call.1
= control target key start
LH: loop header
LB: loop body
LE: loop exit
PB: predicated region body
PF: predicated region fallthrough
CT: control target
= control target key end

     0   :  { %14 = vsyncpa [#allocation3], 0  ;;  %s975_s0 = inlined_call_operand.hbm [shape: f32[8,128], index: 0, kind: input, shape index: {}]   ;;  %s976_s1 = inlined_call_operand.hbm [shape: f32[128,128], index: 1, kind: input, shape index: {}]   ;;  %s977_s2 = inlined_call_operand.vmem [shape: f32[1,128], index: 2, kind: input, shape index: {}]   ;;  %s978_s3 = inlined_call_operand.hbm [shape: f32[128,128], index: 3, kind: input, shape index: {}]   ;;  %s979_s4 = inlined_call_operand.vmem [shape: f32[1,128], index: 4, kind: input, shape index: {}]   ;;  %s980_s5 = inlined_call_operand.hbm [shape: f32[128,128], index: 5, kind: input, shape index: {}]   ;;  %s981_s6 = inlined_call_operand.vmem [shape: f32[1,128], index: 6, kind: input, shape index: {}]   ;;  %s982_s7 = inlined_call_operand.hbm [shape: f32[8,128], index: 7, kind: output, shape index: {0}]   ;;  %s983_s8 = inlined_call_operand.hbm [shape: f32[8,128], index: 8, kind: output, shape index: {1}]  }
   0x1   :  { %15 = vsyncpa [#allocation6], 0 }
   0x2   :  { %16 = vsyncpa [#allocation9], 0 }
   0x3   :  { %17 = vsyncpa [#allocation4], 0 }
   0x4   :  { %18 = vsyncpa [#allocation12], 0  ;;  %s799_s27 = smov [#allocation5]   ;;  %s657_s9 = scalar_lea.hbm %s976_s1, 2048 }
   0x5   :  { %s34_s28 = sshll.u32 %s799_s27, 4  ;;  %p658_p0 = scmp.ne.s32.totalorder %s976_s1, %s657_s9  ;;  %s35_s28 = int_to_ptr.vmem [resolvable:$true] %s34_s28 }
   0x6   :  { %p661_p1 = scmp.lt.u32.totalorder %s657_s9, %s976_s1 }
   0x8   :  { %p663_p2 = pnand %p661_p1, %p658_p0 }
   0xa   :  { %666 = shalt.err (!%p663_p2)
}
   0xb   :  { %s667_s14 = scalar_lea.vmem %s35_s28, 2048  ;;  %p672_p4 = scmp.lt.s32.totalorder %s35_s28, %s35_s28 }
   0xc   :  { %p668_p3 = scmp.ne.s32.totalorder %s35_s28, %s667_s14  ;;  %p673_p5 = scmp.lt.s32.totalorder %s667_s14, %s667_s14 }
   0xe   :  { %p674_p6 = por %p673_p5, %p672_p4 }
  0x10   :  { %p675_p7 = pnand %p674_p6, %p668_p3 }
  0x12   :  { %678 = shalt.err (!%p675_p7)
}
  0x13   :  { %s800_s15 = smov 128   ;;  %s801_s16 = smov 8  }
  0x14   :  { %40 = dma.hbm_to_vmem [thread:$0]  %s976_s1, 2048, %s35_s28, [#allocation6], %s800_s15, %s800_s15, %s801_s16  }
  0x15   :  { %s802_s19 = smov [#allocation2]   ;;  %s803_s21 = smov [#allocation7]  }
  0x16   :  { %s25_s20 = sshll.u32 %s802_s19, 4  ;;  %s48_s22 = sshll.u32 %s803_s21, 4  ;;  %s26_s20 = int_to_ptr.vmem [resolvable:$true] %s25_s20  ;;  %s49_s22 = int_to_ptr.vmem [resolvable:$true] %s48_s22 }
  0x17   :  { %s679_s25 = scalar_lea.hbm %s975_s0, 128 }
  0x18   :  { %p680_p8 = scmp.ne.s32.totalorder %s975_s0, %s679_s25  ;;  %p683_p9 = scmp.lt.u32.totalorder %s679_s25, %s975_s0 }
  0x1a   :  { %p685_p10 = pnand %p683_p9, %p680_p8 }
  0x1c   :  { %688 = shalt.err (!%p685_p10)
}
  0x1d   :  { %s689_s1 = scalar_lea.vmem %s26_s20, 128  ;;  %p694_p12 = scmp.lt.s32.totalorder %s26_s20, %s26_s20 }
  0x1e   :  { %p690_p11 = scmp.ne.s32.totalorder %s26_s20, %s689_s1  ;;  %p695_p13 = scmp.lt.s32.totalorder %s689_s1, %s689_s1 }
  0x20   :  { %p696_p0 = por %p695_p13, %p694_p12 }
  0x22   :  { %p697_p1 = pnand %p696_p0, %p690_p11 }
  0x24   :  { %700 = shalt.err (!%p697_p1)
}
  0x25   :  { %28 = dma.hbm_to_vmem [thread:$0]  %s975_s0, 128, %s26_s20, [#allocation3]  }
  0x26   :  { %s701_s12 = scalar_lea.hbm %s978_s3, 2048 }
  0x27   :  { %p702_p2 = scmp.ne.s32.totalorder %s978_s3, %s701_s12  ;;  %p705_p3 = scmp.lt.u32.totalorder %s701_s12, %s978_s3 }
  0x29   :  { %p707_p4 = pnand %p705_p3, %p702_p2 }
  0x2b   :  { %710 = shalt.err (!%p707_p4)
}
  0x2c   :  { %s711_s19 = scalar_lea.vmem %s49_s22, 2048  ;;  %p716_p6 = scmp.lt.s32.totalorder %s49_s22, %s49_s22 }
  0x2d   :  { %p712_p5 = scmp.ne.s32.totalorder %s49_s22, %s711_s19  ;;  %p717_p7 = scmp.lt.s32.totalorder %s711_s19, %s711_s19 }
  0x2f   :  { %p718_p8 = por %p717_p7, %p716_p6 }
  0x31   :  { %p719_p9 = pnand %p718_p8, %p712_p5 }
  0x33   :  { %722 = shalt.err (!%p719_p9)
}
  0x34   :  { %54 = dma.hbm_to_vmem [thread:$0]  %s978_s3, 2048, %s49_s22, [#allocation6], %s800_s15, %s800_s15, %s801_s16  }
  0x35   :  { %s804_s21 = smov [#allocation8]   ;;  %s723_s26 = scalar_lea.hbm %s980_s5, 2048 }
  0x36   :  { %s62_s23 = sshll.u32 %s804_s21, 4  ;;  %p724_p10 = scmp.ne.s32.totalorder %s980_s5, %s723_s26  ;;  %s63_s23 = int_to_ptr.vmem [resolvable:$true] %s62_s23 }
  0x37   :  { %p727_p11 = scmp.lt.u32.totalorder %s723_s26, %s980_s5 }
  0x39   :  { %p729_p12 = pnand %p727_p11, %p724_p10 }
  0x3b   :  { %732 = shalt.err (!%p729_p12)
}
  0x3c   :  { %s733_s28 = scalar_lea.vmem %s63_s23, 2048  ;;  %p738_p0 = scmp.lt.s32.totalorder %s63_s23, %s63_s23 }
  0x3d   :  { %p734_p13 = scmp.ne.s32.totalorder %s63_s23, %s733_s28  ;;  %p739_p1 = scmp.lt.s32.totalorder %s733_s28, %s733_s28 }
  0x3f   :  { %p740_p2 = por %p739_p1, %p738_p0 }
  0x41   :  { %p741_p3 = pnand %p740_p2, %p734_p13 }
  0x43   :  { %744 = shalt.err (!%p741_p3)
}
  0x44   :  { %68 = dma.hbm_to_vmem [thread:$0]  %s980_s5, 2048, %s63_s23, [#allocation9], %s800_s15, %s800_s15, %s801_s16  }
  0x45   :  { %789 = dma.done.wait [#allocation3], 128  }
  0x46   :  { %790 = vsyncadd [#allocation3], 4294967168 }
  0x47   :  { %791 = dma.done.wait [#allocation6], 4096  }
  0x48   :  { %792 = vsyncadd [#allocation6], 4294963200 }
  0x49   :  { %793 = dma.done.wait [#allocation9], 2048  }
  0x4a   :  { %794 = vsyncadd [#allocation9], 4294965248  ;;  %v805_v0 = vmov 0.0|0.0   ;;  %vm806_vm0 = vmmov 0   ;;  %v807_v1 = vmov 0.0   ;;  %v84_v2 = vld [vmem:[#allocation5] sm:$0xff] }
  0x4b   :  { %570 = vmatprep.subr.bf16.mxu0 %v805_v0  ;;  %497 = vmatprep.mubr.msk.f32.mxu0 %vm806_vm0, %v807_v1  ;;  %v85_v3 = vld [vmem:[#allocation5 + $0x8] sm:$0xff]  ;;  %v86_v4 = vld [vmem:[#allocation5 + $0x10] sm:$0xff]  ;;  %v87_v6 = vld [vmem:[#allocation5 + $0x18] sm:$0xff] }
  0x4c   :  { %594 = vmatprep.subr.bf16.mxu1 %v805_v0  ;;  %532 = vmatprep.mubr.msk.f32.mxu1 %vm806_vm0, %v807_v1  ;;  %v571_v5 = vpack.c.bf16 %v85_v3, %v84_v2  ;;  %v574_v7 = vpack.c.bf16 %v87_v6, %v86_v4  ;;  %v88_v8 = vld [vmem:[#allocation5 + $0x20] sm:$0xff]  ;;  %v89_v9 = vld [vmem:[#allocation5 + $0x28] sm:$0xff]  ;;  %v180_v12 = vld [vmem:[#allocation7 + $0x10] sm:$0xff] }
  0x4d   :  { %v178_v10 = vld [vmem:[#allocation7] sm:$0xff]  ;;  %v179_v11 = vld [vmem:[#allocation7 + $0x8] sm:$0xff]  ;;  %v181_v13 = vld [vmem:[#allocation7 + $0x18] sm:$0xff]  ;;  %v577_v14 = vpack.c.bf16 %v89_v9, %v88_v8 }
  0x4e   :  { %572 = vmatpush3.bf16.msra.mxu0 %v571_v5  ;;  %v595_v15 = vpack.c.bf16 %v179_v11, %v178_v10  ;;  %v90_v16 = vld [vmem:[#allocation5 + $0x30] sm:$0xff]  ;;  %v91_v17 = vld [vmem:[#allocation5 + $0x38] sm:$0xff]  ;;  %v598_v18 = vpack.c.bf16 %v181_v13, %v180_v12  ;;  %v182_v19 = vld [vmem:[#allocation7 + $0x20] sm:$0xff] }
  0x4f   :  { %573 = vmatprep.subr.bf16.mxu0 %v805_v0  ;;  %v183_v20 = vld [vmem:[#allocation7 + $0x28] sm:$0xff]  ;;  %v580_v21 = vpack.c.bf16 %v91_v17, %v90_v16  ;;  %v92_v22 = vld [vmem:[#allocation5 + $0x40] sm:$0xff]  ;;  %v184_v25 = vld [vmem:[#allocation7 + $0x30] sm:$0xff] }
  0x50   :  { %596 = vmatpush3.bf16.msra.mxu1 %v595_v15  ;;  %v93_v23 = vld [vmem:[#allocation5 + $0x48] sm:$0xff]  ;;  %v601_v24 = vpack.c.bf16 %v183_v20, %v182_v19  ;;  %v185_v26 = vld [vmem:[#allocation7 + $0x38] sm:$0xff]  ;;  %v94_v28 = vld [vmem:[#allocation5 + $0x50] sm:$0xff] }
  0x51   :  { %597 = vmatprep.subr.bf16.mxu1 %v805_v0  ;;  %v583_v27 = vpack.c.bf16 %v93_v23, %v92_v22  ;;  %v95_v29 = vld [vmem:[#allocation5 + $0x58] sm:$0xff]  ;;  %v604_v30 = vpack.c.bf16 %v185_v26, %v184_v25  ;;  %v186_v31 = vld [vmem:[#allocation7 + $0x40] sm:$0xff]  ;;  %v187_v32 = vld [vmem:[#allocation7 + $0x48] sm:$0xff] }
  0x52   :  { %575 = vmatpush3.bf16.msra.mxu0 %v574_v7  ;;  %v586_v33 = vpack.c.bf16 %v95_v29, %v94_v28  ;;  %v96_v34 = vld [vmem:[#allocation5 + $0x60] sm:$0xff]  ;;  %v97_v35 = vld [vmem:[#allocation5 + $0x68] sm:$0xff]  ;;  %v607_v36 = vpack.c.bf16 %v187_v32, %v186_v31  ;;  %v188_v37 = vld [vmem:[#allocation7 + $0x50] sm:$0xff] }
  0x53   :  { %576 = vmatprep.subr.bf16.mxu0 %v805_v0  ;;  %v189_v38 = vld [vmem:[#allocation7 + $0x58] sm:$0xff]  ;;  %v589_v39 = vpack.c.bf16 %v97_v35, %v96_v34  ;;  %v98_v40 = vld [vmem:[#allocation5 + $0x70] sm:$0xff]  ;;  %v190_v43 = vld [vmem:[#allocation7 + $0x60] sm:$0xff] }
  0x54   :  { %599 = vmatpush3.bf16.msra.mxu1 %v598_v18  ;;  %v99_v41 = vld [vmem:[#allocation5 + $0x78] sm:$0xff]  ;;  %v610_v42 = vpack.c.bf16 %v189_v38, %v188_v37  ;;  %v191_v44 = vld [vmem:[#allocation7 + $0x68] sm:$0xff]  ;;  %v192_v48 = vld [vmem:[#allocation7 + $0x70] sm:$0xff] }
  0x55   :  { %600 = vmatprep.subr.bf16.mxu1 %v805_v0  ;;  %v592_v45 = vpack.c.bf16 %v99_v41, %v98_v40  ;;  %v613_v46 = vpack.c.bf16 %v191_v44, %v190_v43  ;;  %v83_v47 = vld [vmem:[#allocation2] sm:$0xff]  ;;  %v272_v51 = vld [vmem:[#allocation8] sm:$0xff]  ;;  %v273_v52 = vld [vmem:[#allocation8 + $0x8] sm:$0xff] }
  0x56   :  { %578 = vmatpush3.bf16.msra.mxu0 %v577_v14  ;;  %v193_v49 = vld [vmem:[#allocation7 + $0x78] sm:$0xff]  ;;  %v274_v53 = vld [vmem:[#allocation8 + $0x10] sm:$0xff]  ;;  %v619_v54 = vpack.c.bf16 %v273_v52, %v272_v51  ;;  %v276_v57 = vld [vmem:[#allocation8 + $0x20] sm:$0xff] }
  0x57   :  { %579 = vmatprep.subr.bf16.mxu0 %v805_v0  ;;  %v616_v50 = vpack.c.bf16 %v193_v49, %v192_v48  ;;  %v275_v55 = vld [vmem:[#allocation8 + $0x18] sm:$0xff]  ;;  %v277_v58 = vld [vmem:[#allocation8 + $0x28] sm:$0xff]  ;;  %v278_v60 = vld [vmem:[#allocation8 + $0x30] sm:$0xff] }
  0x58   :  { %602 = vmatpush3.bf16.msra.mxu1 %v601_v24  ;;  %v622_v56 = vpack.c.bf16 %v275_v55, %v274_v53  ;;  %v625_v59 = vpack.c.bf16 %v277_v58, %v276_v57  ;;  %v279_v61 = vld [vmem:[#allocation8 + $0x38] sm:$0xff]  ;;  %v280_v63 = vld [vmem:[#allocation8 + $0x40] sm:$0xff]  ;;  %v282_v3 = vld [vmem:[#allocation8 + $0x50] sm:$0xff] }
  0x59   :  { %603 = vmatprep.subr.bf16.mxu1 %v805_v0  ;;  %v628_v62 = vpack.c.bf16 %v279_v61, %v278_v60  ;;  %v283_v4 = vld [vmem:[#allocation8 + $0x58] sm:$0xff]  ;;  %v284_v6 = vld [vmem:[#allocation8 + $0x60] sm:$0xff]  ;;  %v285_v7 = vld [vmem:[#allocation8 + $0x68] sm:$0xff] }
  0x5a   :  { %581 = vmatpush3.bf16.msra.mxu0 %v580_v21  ;;  %v634_v5 = vpack.c.bf16 %v283_v4, %v282_v3  ;;  %v637_v8 = vpack.c.bf16 %v285_v7, %v284_v6  ;;  %v411_v9 = vld [vmem:[%s977_s2] ss:$0 sm:$0xff]  ;;  %v286_v14 = vld [vmem:[#allocation8 + $0x70] sm:$0xff] }
  0x5b   :  { %582 = vmatprep.subr.bf16.mxu0 %v805_v0  ;;  %v287_v15 = vld [vmem:[#allocation8 + $0x78] sm:$0xff] }
  0x5c   :  { %605 = vmatpush3.bf16.msra.mxu1 %v604_v30  ;;  %v640_v16 = vpack.c.bf16 %v287_v15, %v286_v14  ;;  %v412_v17 = vld [vmem:[%s979_s4] ss:$0 sm:$0xff]  ;;  %s808_s4 = smov [#allocation10]  }
  0x5d   :  { %606 = vmatprep.subr.bf16.mxu1 %v805_v0  ;;  %v413_v21 = vld [vmem:[%s981_s6] ss:$0 sm:$0xff]  ;;  %s386_s11 = sshll.u32 %s808_s4, 4  ;;  %s387_s11 = int_to_ptr.vmem [resolvable:$true] %s386_s11 }
  0x5e   :  { %584 = vmatpush3.bf16.msra.mxu0 %v583_v27  ;;  %s745_s12 = scalar_lea.vmem %s387_s11, 128  ;;  %p750_p5 = scmp.lt.s32.totalorder %s387_s11, %s387_s11 }
  0x5f   :  { %585 = vmatprep.subr.bf16.mxu0 %v805_v0  ;;  %p746_p4 = scmp.ne.s32.totalorder %s387_s11, %s745_s12  ;;  %p751_p6 = scmp.lt.s32.totalorder %s745_s12, %s745_s12 }
  0x60   :  { %608 = vmatpush3.bf16.msra.mxu1 %v607_v36 }
  0x61   :  { %609 = vmatprep.subr.bf16.mxu1 %v805_v0  ;;  %p752_p7 = por %p751_p6, %p750_p5 }
  0x62   :  { %587 = vmatpush3.bf16.msra.mxu0 %v586_v33 }
  0x63   :  { %588 = vmatprep.subr.bf16.mxu0 %v805_v0  ;;  %p753_p8 = pnand %p752_p7, %p746_p4 }
  0x64   :  { %611 = vmatpush3.bf16.msra.mxu1 %v610_v42 }
  0x65   :  { %612 = vmatprep.subr.bf16.mxu1 %v805_v0 }
  0x66   :  { %590 = vmatpush3.bf16.msra.mxu0 %v589_v39 }
  0x67   :  { %591 = vmatprep.subr.bf16.mxu0 %v805_v0 }
  0x68   :  { %614 = vmatpush3.bf16.msra.mxu1 %v613_v46 }
  0x69   :  { %615 = vmatprep.subr.bf16.mxu1 %v805_v0 }
  0x6a   :  { %593 = vmatpush3.bf16.msra.mxu0 %v592_v45 }
  0x6b   :  { %618 = vmatprep.subr.bf16.mxu0 %v805_v0 }
  0x6c   :  { %617 = vmatpush3.bf16.msra.mxu1 %v616_v50 }
  0x6d   :  { %498 = vmatmul.mubr.f32.vlgmr.msra.gmra.mrb[0].mxu0 %v83_v47 }
  0x6e   :  { %567 = vmatprep.mubr.msk.f32.mxu0 %vm806_vm0, %v807_v1  ;;  %620 = vmatpush3.bf16.msra.mxu0 %v619_v54  ;;  %v281_v1 = vld [vmem:[#allocation8 + $0x48] sm:$0xff] }
  0x6f   :  { %621 = vmatprep.subr.bf16.mxu0 %v805_v0  ;;  %v631_v2 = vpack.c.bf16 %v281_v1, %v280_v63 }
  0x72   :  { %623 = vmatpush3.bf16.msra.mxu0 %v622_v56 }
  0x73   :  { %624 = vmatprep.subr.bf16.mxu0 %v805_v0 }
  0x76   :  { %626 = vmatpush3.bf16.msra.mxu0 %v625_v59 }
  0x77   :  { %627 = vmatprep.subr.bf16.mxu0 %v805_v0 }
  0x7a   :  { %629 = vmatpush3.bf16.msra.mxu0 %v628_v62 }
  0x7b   :  { %630 = vmatprep.subr.bf16.mxu0 %v805_v0 }
  0x7e   :  { %632 = vmatpush3.bf16.msra.mxu0 %v631_v2 }
  0x7f   :  { %633 = vmatprep.subr.bf16.mxu0 %v805_v0 }
  0x82   :  { %635 = vmatpush3.bf16.msra.mxu0 %v634_v5 }
  0x83   :  { %636 = vmatprep.subr.bf16.mxu0 %v805_v0 }
  0x86   :  { %638 = vmatpush3.bf16.msra.mxu0 %v637_v8 }
  0x87   :  { %639 = vmatprep.subr.bf16.mxu0 %v805_v0 }
  0x8a   :  { %641 = vmatpush3.bf16.msra.mxu0 %v640_v16 }
 0x140   :  { %v173_v10 = vpop.f32.mrb[0].mxu0 }
 0x141   :  { %v174_v11 = vadd.f32 %v411_v9, %v173_v10  ;;  %v499_v12 = vpop.f32.mrb[1].mxu0 }
 0x143   :  { %v177_v13 = vmax.f32 %v174_v11, 0.0 }
 0x145   :  { %533 = vmatmul.mubr.f32.vlgmr.msra.gmra.mrb[0].mxu1 %v177_v13 }
 0x218   :  { %v267_v18 = vpop.f32.mrb[0].mxu1 }
 0x219   :  { %v268_v19 = vadd.f32 %v412_v17, %v267_v18  ;;  %v534_v0 = vpop.f32.mrb[1].mxu1 }
 0x21b   :  { %271 = vst [vmem:[#allocation10] sm:$0xff] %v268_v19  ;;  %568 = vmatmul.mubr.f32.vlgmr.msra.gmra.mrb[2].mxu0 %v268_v19  ;;  %v358_v20 = vmul.f32 %v268_v19, %v268_v19 }
 0x21d   :  { %359 = vadd.xlane.f32.xlu0 %v358_v20 }
 0x2aa   :  { %v360_v22 = vpop.xlane.xlu0 %359 }
 0x2ab   :  { %v368_v24 = vadd.f32 %v413_v21, %v360_v22 }
 0x2ee   :  { %v354_v23 = vpop.f32.mrb[2].mxu0 }
 0x2ef   :  { %v369_v25 = vmul.f32 2.0, %v354_v23  ;;  %v569_v26 = vpop.f32.mrb[3].mxu0 }
 0x2f1   :  { %v370_v27 = vsub.f32 %v368_v24, %v369_v25 }
 0x2f3   :  { %v371_v28 = vmax.f32 %v370_v27, 0.0 }
 0x2f5   :  { %v372_v29 = vadd.f32 1.0, %v371_v28 }
 0x2f7   :  { %653 = vrcp.f32 %v372_v29 }
 0x301   :  { %v654_v30 = vpop.eup %653 }
 0x302   :  { %v374_v31 = vmul.f32 %v654_v30, %v654_v30 }
 0x304   :  { %375 = vadd.xlane.f32.xlu0 %v374_v31 }
 0x305   :  { %756 = shalt.err (!%p753_p8)
}
 0x306   :  { %s757_s14 = scalar_lea.hbm %s982_s7, 128 }
 0x307   :  { %p758_p9 = scmp.ne.s32.totalorder %s982_s7, %s757_s14  ;;  %p761_p10 = scmp.lt.u32.totalorder %s757_s14, %s982_s7 }
 0x309   :  { %p763_p11 = pnand %p761_p10, %p758_p9 }
 0x30b   :  { %766 = shalt.err (!%p763_p11)
}
 0x30c   :  { %389 = dma.vmem_to_hbm [thread:$0]  %s387_s11, 128, %s982_s7, [#allocation4]  }
 0x30d   :  { %s809_s23 = smov [#allocation11]  }
 0x30e   :  { %s396_s24 = sshll.u32 %s809_s23, 4  ;;  %s397_s24 = int_to_ptr.vmem [resolvable:$true] %s396_s24 }
 0x30f   :  { %s767_s25 = scalar_lea.vmem %s397_s24, 128  ;;  %p772_p13 = scmp.lt.s32.totalorder %s397_s24, %s397_s24 }
 0x310   :  { %p768_p12 = scmp.ne.s32.totalorder %s397_s24, %s767_s25  ;;  %p773_p0 = scmp.lt.s32.totalorder %s767_s25, %s767_s25 }
 0x312   :  { %p774_p1 = por %p773_p0, %p772_p13 }
 0x314   :  { %p775_p2 = pnand %p774_p1, %p768_p12 }
 0x391   :  { %v376_v32 = vpop.xlane.xlu0 %375 }
 0x392   :  { %655 = vrcp.f32 %v376_v32 }
 0x39c   :  { %v656_v33 = vpop.eup %655 }
 0x39d   :  { %v378_v34 = vmul.f32 %v656_v33, %v374_v31 }
 0x39f   :  { %379 = vst [vmem:[#allocation11] sm:$0xff] %v378_v34 }
 0x3a0   :  { %778 = shalt.err (!%p775_p2)
}
 0x3a1   :  { %s779_s29 = scalar_lea.hbm %s983_s8, 128 }
 0x3a2   :  { %p780_p3 = scmp.ne.s32.totalorder %s983_s8, %s779_s29  ;;  %p783_p4 = scmp.lt.u32.totalorder %s779_s29, %s983_s8 }
 0x3a4   :  { %p785_p5 = pnand %p783_p4, %p780_p3 }
 0x3a6   :  { %788 = shalt.err (!%p785_p5)
}
 0x3a7   :  { %399 = dma.vmem_to_hbm [thread:$0]  %s397_s24, 128, %s983_s8, [#allocation12]  }
 0x3a8   :  { %795 = dma.done.wait [#allocation4], 128  }
 0x3a9   :  { %796 = vsyncadd [#allocation4], 4294967168 }
 0x3aa   :  { %797 = dma.done.wait [#allocation12], 128  }
 0x3ab   :  { %798 = vsyncadd [#allocation12], 4294967168 }
 0x3ac   :  { %406 = vsyncpa [#allocation3], 1 }
 0x3ad   :  { %407 = vsyncpa [#allocation6], 1 }
 0x3ae   :  { %408 = vsyncpa [#allocation9], 1 }
 0x3af   :  { %409 = vsyncpa [#allocation4], 1 }
 0x3b0   :  { %410 = vsyncpa [#allocation12], 1 }

// kernel: tpu_custom_call.1
= control target key start
LH: loop header
LB: loop body
LE: loop exit
PB: predicated region body
PF: predicated region fallthrough
CT: control target
= control target key end

     0   :  { %14 = vsyncpa [#allocation3], 0  ;;  %s975_s0 = inlined_call_operand.hbm [shape: f32[8,128], index: 0, kind: input, shape index: {}]   ;;  %s976_s1 = inlined_call_operand.hbm [shape: f32[128,128], index: 1, kind: input, shape index: {}]   ;;  %s977_s2 = inlined_call_operand.vmem [shape: f32[1,128], index: 2, kind: input, shape index: {}]   ;;  %s978_s3 = inlined_call_operand.hbm [shape: f32[128,128], index: 3, kind: input, shape index: {}]   ;;  %s979_s4 = inlined_call_operand.vmem [shape: f32[1,128], index: 4, kind: input, shape index: {}]   ;;  %s980_s5 = inlined_call_operand.hbm [shape: f32[128,128], index: 5, kind: input, shape index: {}]   ;;  %s981_s6 = inlined_call_operand.vmem [shape: f32[1,128], index: 6, kind: input, shape index: {}]   ;;  %s982_s7 = inlined_call_operand.hbm [shape: f32[8,128], index: 7, kind: output, shape index: {0}]   ;;  %s983_s8 = inlined_call_operand.hbm [shape: f32[8,128], index: 8, kind: output, shape index: {1}]  }
   0x1   :  { %15 = vsyncpa [#allocation6], 0 }
   0x2   :  { %16 = vsyncpa [#allocation9], 0 }
   0x3   :  { %17 = vsyncpa [#allocation4], 0 }
   0x4   :  { %18 = vsyncpa [#allocation12], 0  ;;  %s799_s27 = smov [#allocation5]   ;;  %s657_s9 = scalar_lea.hbm %s976_s1, 2048 }
   0x5   :  { %s34_s28 = sshll.u32 %s799_s27, 4  ;;  %p658_p0 = scmp.ne.s32.totalorder %s976_s1, %s657_s9  ;;  %s35_s28 = int_to_ptr.vmem [resolvable:$true] %s34_s28 }
   0x6   :  { %p661_p1 = scmp.lt.u32.totalorder %s657_s9, %s976_s1 }
   0x8   :  { %p663_p2 = pnand %p661_p1, %p658_p0 }
   0xa   :  { %666 = shalt.err (!%p663_p2)
}
   0xb   :  { %s667_s14 = scalar_lea.vmem %s35_s28, 2048  ;;  %p672_p4 = scmp.lt.s32.totalorder %s35_s28, %s35_s28 }
   0xc   :  { %p668_p3 = scmp.ne.s32.totalorder %s35_s28, %s667_s14  ;;  %p673_p5 = scmp.lt.s32.totalorder %s667_s14, %s667_s14 }
   0xe   :  { %p674_p6 = por %p673_p5, %p672_p4 }
  0x10   :  { %p675_p7 = pnand %p674_p6, %p668_p3 }
  0x12   :  { %678 = shalt.err (!%p675_p7)
}
  0x13   :  { %s800_s15 = smov 128   ;;  %s801_s16 = smov 8  }
  0x14   :  { %40 = dma.hbm_to_vmem [thread:$0]  %s976_s1, 2048, %s35_s28, [#allocation6], %s800_s15, %s800_s15, %s801_s16  }
  0x15   :  { %s802_s19 = smov [#allocation2]   ;;  %s803_s21 = smov [#allocation7]  }
  0x16   :  { %s25_s20 = sshll.u32 %s802_s19, 4  ;;  %s48_s22 = sshll.u32 %s803_s21, 4  ;;  %s26_s20 = int_to_ptr.vmem [resolvable:$true] %s25_s20  ;;  %s49_s22 = int_to_ptr.vmem [resolvable:$true] %s48_s22 }
  0x17   :  { %s679_s25 = scalar_lea.hbm %s975_s0, 128 }
  0x18   :  { %p680_p8 = scmp.ne.s32.totalorder %s975_s0, %s679_s25  ;;  %p683_p9 = scmp.lt.u32.totalorder %s679_s25, %s975_s0 }
  0x1a   :  { %p685_p10 = pnand %p683_p9, %p680_p8 }
  0x1c   :  { %688 = shalt.err (!%p685_p10)
}
  0x1d   :  { %s689_s1 = scalar_lea.vmem %s26_s20, 128  ;;  %p694_p12 = scmp.lt.s32.totalorder %s26_s20, %s26_s20 }
  0x1e   :  { %p690_p11 = scmp.ne.s32.totalorder %s26_s20, %s689_s1  ;;  %p695_p13 = scmp.lt.s32.totalorder %s689_s1, %s689_s1 }
  0x20   :  { %p696_p0 = por %p695_p13, %p694_p12 }
  0x22   :  { %p697_p1 = pnand %p696_p0, %p690_p11 }
  0x24   :  { %700 = shalt.err (!%p697_p1)
}
  0x25   :  { %28 = dma.hbm_to_vmem [thread:$0]  %s975_s0, 128, %s26_s20, [#allocation3]  }
  0x26   :  { %s701_s12 = scalar_lea.hbm %s978_s3, 2048 }
  0x27   :  { %p702_p2 = scmp.ne.s32.totalorder %s978_s3, %s701_s12  ;;  %p705_p3 = scmp.lt.u32.totalorder %s701_s12, %s978_s3 }
  0x29   :  { %p707_p4 = pnand %p705_p3, %p702_p2 }
  0x2b   :  { %710 = shalt.err (!%p707_p4)
}
  0x2c   :  { %s711_s19 = scalar_lea.vmem %s49_s22, 2048  ;;  %p716_p6 = scmp.lt.s32.totalorder %s49_s22, %s49_s22 }
  0x2d   :  { %p712_p5 = scmp.ne.s32.totalorder %s49_s22, %s711_s19  ;;  %p717_p7 = scmp.lt.s32.totalorder %s711_s19, %s711_s19 }
  0x2f   :  { %p718_p8 = por %p717_p7, %p716_p6 }
  0x31   :  { %p719_p9 = pnand %p718_p8, %p712_p5 }
  0x33   :  { %722 = shalt.err (!%p719_p9)
}
  0x34   :  { %54 = dma.hbm_to_vmem [thread:$0]  %s978_s3, 2048, %s49_s22, [#allocation6], %s800_s15, %s800_s15, %s801_s16  }
  0x35   :  { %s804_s21 = smov [#allocation8]   ;;  %s723_s26 = scalar_lea.hbm %s980_s5, 2048 }
  0x36   :  { %s62_s23 = sshll.u32 %s804_s21, 4  ;;  %p724_p10 = scmp.ne.s32.totalorder %s980_s5, %s723_s26  ;;  %s63_s23 = int_to_ptr.vmem [resolvable:$true] %s62_s23 }
  0x37   :  { %p727_p11 = scmp.lt.u32.totalorder %s723_s26, %s980_s5 }
  0x39   :  { %p729_p12 = pnand %p727_p11, %p724_p10 }
  0x3b   :  { %732 = shalt.err (!%p729_p12)
}
  0x3c   :  { %s733_s28 = scalar_lea.vmem %s63_s23, 2048  ;;  %p738_p0 = scmp.lt.s32.totalorder %s63_s23, %s63_s23 }
  0x3d   :  { %p734_p13 = scmp.ne.s32.totalorder %s63_s23, %s733_s28  ;;  %p739_p1 = scmp.lt.s32.totalorder %s733_s28, %s733_s28 }
  0x3f   :  { %p740_p2 = por %p739_p1, %p738_p0 }
  0x41   :  { %p741_p3 = pnand %p740_p2, %p734_p13 }
  0x43   :  { %744 = shalt.err (!%p741_p3)
}
  0x44   :  { %68 = dma.hbm_to_vmem [thread:$0]  %s980_s5, 2048, %s63_s23, [#allocation9], %s800_s15, %s800_s15, %s801_s16  }
  0x45   :  { %789 = dma.done.wait [#allocation3], 128  }
  0x46   :  { %790 = vsyncadd [#allocation3], 4294967168 }
  0x47   :  { %791 = dma.done.wait [#allocation6], 4096  }
  0x48   :  { %792 = vsyncadd [#allocation6], 4294963200 }
  0x49   :  { %793 = dma.done.wait [#allocation9], 2048  }
  0x4a   :  { %794 = vsyncadd [#allocation9], 4294965248  ;;  %v805_v0 = vmov 0.0|0.0   ;;  %vm806_vm0 = vmmov 0   ;;  %v807_v1 = vmov 0.0   ;;  %v84_v2 = vld [vmem:[#allocation5] sm:$0xff] }
  0x4b   :  { %570 = vmatprep.subr.bf16.mxu0 %v805_v0  ;;  %497 = vmatprep.mubr.msk.f32.mxu0 %vm806_vm0, %v807_v1  ;;  %v85_v3 = vld [vmem:[#allocation5 + $0x8] sm:$0xff]  ;;  %v86_v4 = vld [vmem:[#allocation5 + $0x10] sm:$0xff]  ;;  %v87_v6 = vld [vmem:[#allocation5 + $0x18] sm:$0xff] }
  0x4c   :  { %594 = vmatprep.subr.bf16.mxu1 %v805_v0  ;;  %532 = vmatprep.mubr.msk.f32.mxu1 %vm806_vm0, %v807_v1  ;;  %v571_v5 = vpack.c.bf16 %v85_v3, %v84_v2  ;;  %v574_v7 = vpack.c.bf16 %v87_v6, %v86_v4  ;;  %v88_v8 = vld [vmem:[#allocation5 + $0x20] sm:$0xff]  ;;  %v89_v9 = vld [vmem:[#allocation5 + $0x28] sm:$0xff]  ;;  %v180_v12 = vld [vmem:[#allocation7 + $0x10] sm:$0xff] }
  0x4d   :  { %v178_v10 = vld [vmem:[#allocation7] sm:$0xff]  ;;  %v179_v11 = vld [vmem:[#allocation7 + $0x8] sm:$0xff]  ;;  %v181_v13 = vld [vmem:[#allocation7 + $0x18] sm:$0xff]  ;;  %v577_v14 = vpack.c.bf16 %v89_v9, %v88_v8 }
  0x4e   :  { %572 = vmatpush3.bf16.msra.mxu0 %v571_v5  ;;  %v595_v15 = vpack.c.bf16 %v179_v11, %v178_v10  ;;  %v90_v16 = vld [vmem:[#allocation5 + $0x30] sm:$0xff]  ;;  %v91_v17 = vld [vmem:[#allocation5 + $0x38] sm:$0xff]  ;;  %v598_v18 = vpack.c.bf16 %v181_v13, %v180_v12  ;;  %v182_v19 = vld [vmem:[#allocation7 + $0x20] sm:$0xff] }
  0x4f   :  { %573 = vmatprep.subr.bf16.mxu0 %v805_v0  ;;  %v183_v20 = vld [vmem:[#allocation7 + $0x28] sm:$0xff]  ;;  %v580_v21 = vpack.c.bf16 %v91_v17, %v90_v16  ;;  %v92_v22 = vld [vmem:[#allocation5 + $0x40] sm:$0xff]  ;;  %v184_v25 = vld [vmem:[#allocation7 + $0x30] sm:$0xff] }
  0x50   :  { %596 = vmatpush3.bf16.msra.mxu1 %v595_v15  ;;  %v93_v23 = vld [vmem:[#allocation5 + $0x48] sm:$0xff]  ;;  %v601_v24 = vpack.c.bf16 %v183_v20, %v182_v19  ;;  %v185_v26 = vld [vmem:[#allocation7 + $0x38] sm:$0xff]  ;;  %v94_v28 = vld [vmem:[#allocation5 + $0x50] sm:$0xff] }
  0x51   :  { %597 = vmatprep.subr.bf16.mxu1 %v805_v0  ;;  %v583_v27 = vpack.c.bf16 %v93_v23, %v92_v22  ;;  %v95_v29 = vld [vmem:[#allocation5 + $0x58] sm:$0xff]  ;;  %v604_v30 = vpack.c.bf16 %v185_v26, %v184_v25  ;;  %v186_v31 = vld [vmem:[#allocation7 + $0x40] sm:$0xff]  ;;  %v187_v32 = vld [vmem:[#allocation7 + $0x48] sm:$0xff] }
  0x52   :  { %575 = vmatpush3.bf16.msra.mxu0 %v574_v7  ;;  %v586_v33 = vpack.c.bf16 %v95_v29, %v94_v28  ;;  %v96_v34 = vld [vmem:[#allocation5 + $0x60] sm:$0xff]  ;;  %v97_v35 = vld [vmem:[#allocation5 + $0x68] sm:$0xff]  ;;  %v607_v36 = vpack.c.bf16 %v187_v32, %v186_v31  ;;  %v188_v37 = vld [vmem:[#allocation7 + $0x50] sm:$0xff] }
  0x53   :  { %576 = vmatprep.subr.bf16.mxu0 %v805_v0  ;;  %v189_v38 = vld [vmem:[#allocation7 + $0x58] sm:$0xff]  ;;  %v589_v39 = vpack.c.bf16 %v97_v35, %v96_v34  ;;  %v98_v40 = vld [vmem:[#allocation5 + $0x70] sm:$0xff]  ;;  %v190_v43 = vld [vmem:[#allocation7 + $0x60] sm:$0xff] }
  0x54   :  { %599 = vmatpush3.bf16.msra.mxu1 %v598_v18  ;;  %v99_v41 = vld [vmem:[#allocation5 + $0x78] sm:$0xff]  ;;  %v610_v42 = vpack.c.bf16 %v189_v38, %v188_v37  ;;  %v191_v44 = vld [vmem:[#allocation7 + $0x68] sm:$0xff]  ;;  %v192_v48 = vld [vmem:[#allocation7 + $0x70] sm:$0xff] }
  0x55   :  { %600 = vmatprep.subr.bf16.mxu1 %v805_v0  ;;  %v592_v45 = vpack.c.bf16 %v99_v41, %v98_v40  ;;  %v613_v46 = vpack.c.bf16 %v191_v44, %v190_v43  ;;  %v83_v47 = vld [vmem:[#allocation2] sm:$0xff]  ;;  %v272_v51 = vld [vmem:[#allocation8] sm:$0xff]  ;;  %v273_v52 = vld [vmem:[#allocation8 + $0x8] sm:$0xff] }
  0x56   :  { %578 = vmatpush3.bf16.msra.mxu0 %v577_v14  ;;  %v193_v49 = vld [vmem:[#allocation7 + $0x78] sm:$0xff]  ;;  %v274_v53 = vld [vmem:[#allocation8 + $0x10] sm:$0xff]  ;;  %v619_v54 = vpack.c.bf16 %v273_v52, %v272_v51  ;;  %v276_v57 = vld [vmem:[#allocation8 + $0x20] sm:$0xff] }
  0x57   :  { %579 = vmatprep.subr.bf16.mxu0 %v805_v0  ;;  %v616_v50 = vpack.c.bf16 %v193_v49, %v192_v48  ;;  %v275_v55 = vld [vmem:[#allocation8 + $0x18] sm:$0xff]  ;;  %v277_v58 = vld [vmem:[#allocation8 + $0x28] sm:$0xff]  ;;  %v278_v60 = vld [vmem:[#allocation8 + $0x30] sm:$0xff] }
  0x58   :  { %602 = vmatpush3.bf16.msra.mxu1 %v601_v24  ;;  %v622_v56 = vpack.c.bf16 %v275_v55, %v274_v53  ;;  %v625_v59 = vpack.c.bf16 %v277_v58, %v276_v57  ;;  %v279_v61 = vld [vmem:[#allocation8 + $0x38] sm:$0xff]  ;;  %v280_v63 = vld [vmem:[#allocation8 + $0x40] sm:$0xff]  ;;  %v282_v3 = vld [vmem:[#allocation8 + $0x50] sm:$0xff] }
  0x59   :  { %603 = vmatprep.subr.bf16.mxu1 %v805_v0  ;;  %v628_v62 = vpack.c.bf16 %v279_v61, %v278_v60  ;;  %v283_v4 = vld [vmem:[#allocation8 + $0x58] sm:$0xff]  ;;  %v284_v6 = vld [vmem:[#allocation8 + $0x60] sm:$0xff]  ;;  %v285_v7 = vld [vmem:[#allocation8 + $0x68] sm:$0xff] }
  0x5a   :  { %581 = vmatpush3.bf16.msra.mxu0 %v580_v21  ;;  %v634_v5 = vpack.c.bf16 %v283_v4, %v282_v3  ;;  %v637_v8 = vpack.c.bf16 %v285_v7, %v284_v6  ;;  %v411_v9 = vld [vmem:[%s977_s2] ss:$0 sm:$0xff]  ;;  %v286_v14 = vld [vmem:[#allocation8 + $0x70] sm:$0xff] }
  0x5b   :  { %582 = vmatprep.subr.bf16.mxu0 %v805_v0  ;;  %v287_v15 = vld [vmem:[#allocation8 + $0x78] sm:$0xff] }
  0x5c   :  { %605 = vmatpush3.bf16.msra.mxu1 %v604_v30  ;;  %v640_v16 = vpack.c.bf16 %v287_v15, %v286_v14  ;;  %v412_v17 = vld [vmem:[%s979_s4] ss:$0 sm:$0xff]  ;;  %s808_s4 = smov [#allocation10]  }
  0x5d   :  { %606 = vmatprep.subr.bf16.mxu1 %v805_v0  ;;  %v413_v21 = vld [vmem:[%s981_s6] ss:$0 sm:$0xff]  ;;  %s386_s11 = sshll.u32 %s808_s4, 4  ;;  %s387_s11 = int_to_ptr.vmem [resolvable:$true] %s386_s11 }
  0x5e   :  { %584 = vmatpush3.bf16.msra.mxu0 %v583_v27  ;;  %s745_s12 = scalar_lea.vmem %s387_s11, 128  ;;  %p750_p5 = scmp.lt.s32.totalorder %s387_s11, %s387_s11 }
  0x5f   :  { %585 = vmatprep.subr.bf16.mxu0 %v805_v0  ;;  %p746_p4 = scmp.ne.s32.totalorder %s387_s11, %s745_s12  ;;  %p751_p6 = scmp.lt.s32.totalorder %s745_s12, %s745_s12 }
  0x60   :  { %608 = vmatpush3.bf16.msra.mxu1 %v607_v36 }
  0x61   :  { %609 = vmatprep.subr.bf16.mxu1 %v805_v0  ;;  %p752_p7 = por %p751_p6, %p750_p5 }
  0x62   :  { %587 = vmatpush3.bf16.msra.mxu0 %v586_v33 }
  0x63   :  { %588 = vmatprep.subr.bf16.mxu0 %v805_v0  ;;  %p753_p8 = pnand %p752_p7, %p746_p4 }
  0x64   :  { %611 = vmatpush3.bf16.msra.mxu1 %v610_v42 }
  0x65   :  { %612 = vmatprep.subr.bf16.mxu1 %v805_v0 }
  0x66   :  { %590 = vmatpush3.bf16.msra.mxu0 %v589_v39 }
  0x67   :  { %591 = vmatprep.subr.bf16.mxu0 %v805_v0 }
  0x68   :  { %614 = vmatpush3.bf16.msra.mxu1 %v613_v46 }
  0x69   :  { %615 = vmatprep.subr.bf16.mxu1 %v805_v0 }
  0x6a   :  { %593 = vmatpush3.bf16.msra.mxu0 %v592_v45 }
  0x6b   :  { %618 = vmatprep.subr.bf16.mxu0 %v805_v0 }
  0x6c   :  { %617 = vmatpush3.bf16.msra.mxu1 %v616_v50 }
  0x6d   :  { %498 = vmatmul.mubr.f32.vlgmr.msra.gmra.mrb[0].mxu0 %v83_v47 }
  0x6e   :  { %567 = vmatprep.mubr.msk.f32.mxu0 %vm806_vm0, %v807_v1  ;;  %620 = vmatpush3.bf16.msra.mxu0 %v619_v54  ;;  %v281_v1 = vld [vmem:[#allocation8 + $0x48] sm:$0xff] }
  0x6f   :  { %621 = vmatprep.subr.bf16.mxu0 %v805_v0  ;;  %v631_v2 = vpack.c.bf16 %v281_v1, %v280_v63 }
  0x72   :  { %623 = vmatpush3.bf16.msra.mxu0 %v622_v56 }
  0x73   :  { %624 = vmatprep.subr.bf16.mxu0 %v805_v0 }
  0x76   :  { %626 = vmatpush3.bf16.msra.mxu0 %v625_v59 }
  0x77   :  { %627 = vmatprep.subr.bf16.mxu0 %v805_v0 }
  0x7a   :  { %629 = vmatpush3.bf16.msra.mxu0 %v628_v62 }
  0x7b   :  { %630 = vmatprep.subr.bf16.mxu0 %v805_v0 }
  0x7e   :  { %632 = vmatpush3.bf16.msra.mxu0 %v631_v2 }
  0x7f   :  { %633 = vmatprep.subr.bf16.mxu0 %v805_v0 }
  0x82   :  { %635 = vmatpush3.bf16.msra.mxu0 %v634_v5 }
  0x83   :  { %636 = vmatprep.subr.bf16.mxu0 %v805_v0 }
  0x86   :  { %638 = vmatpush3.bf16.msra.mxu0 %v637_v8 }
  0x87   :  { %639 = vmatprep.subr.bf16.mxu0 %v805_v0 }
  0x8a   :  { %641 = vmatpush3.bf16.msra.mxu0 %v640_v16 }
 0x140   :  { %v173_v10 = vpop.f32.mrb[0].mxu0 }
 0x141   :  { %v174_v11 = vadd.f32 %v411_v9, %v173_v10  ;;  %v499_v12 = vpop.f32.mrb[1].mxu0 }
 0x143   :  { %v177_v13 = vmax.f32 %v174_v11, 0.0 }
 0x145   :  { %533 = vmatmul.mubr.f32.vlgmr.msra.gmra.mrb[0].mxu1 %v177_v13 }
 0x218   :  { %v267_v18 = vpop.f32.mrb[0].mxu1 }
 0x219   :  { %v268_v19 = vadd.f32 %v412_v17, %v267_v18  ;;  %v534_v0 = vpop.f32.mrb[1].mxu1 }
 0x21b   :  { %271 = vst [vmem:[#allocation10] sm:$0xff] %v268_v19  ;;  %568 = vmatmul.mubr.f32.vlgmr.msra.gmra.mrb[2].mxu0 %v268_v19  ;;  %v358_v20 = vmul.f32 %v268_v19, %v268_v19 }
 0x21d   :  { %359 = vadd.xlane.f32.xlu0 %v358_v20 }
 0x2aa   :  { %v360_v22 = vpop.xlane.xlu0 %359 }
 0x2ab   :  { %v368_v24 = vadd.f32 %v413_v21, %v360_v22 }
 0x2ee   :  { %v354_v23 = vpop.f32.mrb[2].mxu0 }
 0x2ef   :  { %v369_v25 = vmul.f32 2.0, %v354_v23  ;;  %v569_v26 = vpop.f32.mrb[3].mxu0 }
 0x2f1   :  { %v370_v27 = vsub.f32 %v368_v24, %v369_v25 }
 0x2f3   :  { %v371_v28 = vmax.f32 %v370_v27, 0.0 }
 0x2f5   :  { %v372_v29 = vadd.f32 1.0, %v371_v28 }
 0x2f7   :  { %653 = vrcp.f32 %v372_v29 }
 0x301   :  { %v654_v30 = vpop.eup %653 }
 0x302   :  { %v374_v31 = vmul.f32 %v654_v30, %v654_v30 }
 0x304   :  { %375 = vadd.xlane.f32.xlu0 %v374_v31 }
 0x305   :  { %756 = shalt.err (!%p753_p8)
}
 0x306   :  { %s757_s14 = scalar_lea.hbm %s982_s7, 128 }
 0x307   :  { %p758_p9 = scmp.ne.s32.totalorder %s982_s7, %s757_s14  ;;  %p761_p10 = scmp.lt.u32.totalorder %s757_s14, %s982_s7 }
 0x309   :  { %p763_p11 = pnand %p761_p10, %p758_p9 }
 0x30b   :  { %766 = shalt.err (!%p763_p11)
}
 0x30c   :  { %389 = dma.vmem_to_hbm [thread:$0]  %s387_s11, 128, %s982_s7, [#allocation4]  }
 0x30d   :  { %s809_s23 = smov [#allocation11]  }
 0x30e   :  { %s396_s24 = sshll.u32 %s809_s23, 4  ;;  %s397_s24 = int_to_ptr.vmem [resolvable:$true] %s396_s24 }
 0x30f   :  { %s767_s25 = scalar_lea.vmem %s397_s24, 128  ;;  %p772_p13 = scmp.lt.s32.totalorder %s397_s24, %s397_s24 }
 0x310   :  { %p768_p12 = scmp.ne.s32.totalorder %s397_s24, %s767_s25  ;;  %p773_p0 = scmp.lt.s32.totalorder %s767_s25, %s767_s25 }
 0x312   :  { %p774_p1 = por %p773_p0, %p772_p13 }
 0x314   :  { %p775_p2 = pnand %p774_p1, %p768_p12 }
 0x391   :  { %v376_v32 = vpop.xlane.xlu0 %375 }
 0x392   :  { %655 = vrcp.f32 %v376_v32 }
 0x39c   :  { %v656_v33 = vpop.eup %655 }
 0x39d   :  { %v378_v34 = vmul.f32 %v656_v33, %v374_v31 }
 0x39f   :  { %379 = vst [vmem:[#allocation11] sm:$0xff] %v378_v34 }
 0x3a0   :  { %778 = shalt.err (!%p775_p2)
}
 0x3a1   :  { %s779_s29 = scalar_lea.hbm %s983_s8, 128 }
 0x3a2   :  { %p780_p3 = scmp.ne.s32.totalorder %s983_s8, %s779_s29  ;;  %p783_p4 = scmp.lt.u32.totalorder %s779_s29, %s983_s8 }
 0x3a4   :  { %p785_p5 = pnand %p783_p4, %p780_p3 }
 0x3a6   :  { %788 = shalt.err (!%p785_p5)
}
 0x3a7   :  { %399 = dma.vmem_to_hbm [thread:$0]  %s397_s24, 128, %s983_s8, [#allocation12]  }
 0x3a8   :  { %795 = dma.done.wait [#allocation4], 128  }
 0x3a9   :  { %796 = vsyncadd [#allocation4], 4294967168 }
 0x3aa   :  { %797 = dma.done.wait [#allocation12], 128  }
 0x3ab   :  { %798 = vsyncadd [#allocation12], 4294967168 }
 0x3ac   :  { %406 = vsyncpa [#allocation3], 1 }
 0x3ad   :  { %407 = vsyncpa [#allocation6], 1 }
 0x3ae   :  { %408 = vsyncpa [#allocation9], 1 }
 0x3af   :  { %409 = vsyncpa [#allocation4], 1 }
 0x3b0   :  { %410 = vsyncpa [#allocation12], 1 }

</bundles_post_ra>
